<compile_context>
chip_gen: v6e
topology: v6e:2x2x1
jax: 0.10.0
libtpu: 0.0.40
codegen_flags: <defaults>
</compile_context>

<pallas_src>
import functools

import jax
import jax.numpy as jnp
from jax.experimental import pallas as pl
from jax.experimental.pallas import tpu as pltpu

LANE = 128
SUBLANE = 8


def _round_up(n, m):
    return ((n + m - 1) // m) * m


# ---------------------------------------------------------------------------
# Fused kernel: layer 1 (numerical matmul + single multi-hot embedding matmul)
# followed by the remaining Linear(+ReLU) layers, all in one invocation per
# batch tile.  Weights are whole-array VMEM-resident blocks.
# ---------------------------------------------------------------------------
def _make_kernel(n_emb: int, n_rest: int):
    def kernel(*refs):
        x_num_ref = refs[0]            # (TB, n_num)          f32
        x_cat_ref = refs[1]            # (TB, n_emb)          i32  (offsets baked in)
        w1_num_ref = refs[2]           # (n_num, h1)          bf16
        folded_ref = refs[3]           # (total_rows_pad, h1) bf16 (stacked E_i @ W1_i)
        b1_ref = refs[4]               # (1, h1)              f32
        rest_refs = refs[5:5 + 2 * n_rest]
        o_ref = refs[5 + 2 * n_rest]   # (TB, out_pad)        f32

        x_num = x_num_ref[...]
        x_cat = x_cat_ref[...]
        tb = x_num.shape[0]
        total_rows = folded_ref.shape[0]

        # ---- Layer 1, numerical part (one MXU push).
        h = jnp.dot(x_num.astype(jnp.bfloat16), w1_num_ref[...],
                    preferred_element_type=jnp.float32)

        # ---- Layer 1, categorical part: single multi-hot x folded-slab matmul.
        # Row ranges of the stacked slab are disjoint per feature, so OR-ing
        # the per-feature one-hots gives the exact multi-hot selector.
        iota = jax.lax.broadcasted_iota(jnp.int32, (tb, total_rows), 1)
        hot = x_cat[:, 0:1] == iota
        for i in range(1, n_emb):
            hot = hot | (x_cat[:, i:i + 1] == iota)
        multihot = hot.astype(jnp.float32).astype(jnp.bfloat16)
        h = h + jnp.dot(multihot, folded_ref[...],
                        preferred_element_type=jnp.float32)
        h = h + b1_ref[...]
        if n_rest > 0:
            h = jnp.maximum(h, 0.0)
            # TODO(synk): Dropout(0.1) after each hidden ReLU is identity at inference.

        # ---- Remaining layers (intermediates stay in vregs, true widths).
        for li in range(n_rest):
            w = rest_refs[2 * li][...]          # bf16
            b = rest_refs[2 * li + 1][...]      # f32
            h = jnp.dot(h.astype(jnp.bfloat16), w,
                        preferred_element_type=jnp.float32) + b
            if li < n_rest - 1:
                h = jnp.maximum(h, 0.0)

        o_ref[...] = h.astype(o_ref.dtype)

    return kernel


# ---------------------------------------------------------------------------
# Forward pass (jitted): one pallas_call over batch tiles, then slice the
# real rows / output columns.
# ---------------------------------------------------------------------------
@functools.partial(jax.jit, static_argnames=("num_target_classes",))
def forward(fused_params, x_num, x_cat, *, num_target_classes):
    w1_num = fused_params["w1_num"]
    folded = fused_params["folded"]
    b1 = fused_params["b1"]
    offsets = fused_params["offsets"]        # (1, n_emb) int32 slab row offsets
    rest = fused_params["rest"]

    n_emb = offsets.shape[1]
    n_rest = len(rest)
    B, n_num = x_num.shape
    out_w = rest[-1][0].shape[1] if rest else w1_num.shape[1]

    # Batch tile: up to 512 rows (fits comfortably in every generation's
    # scoped-VMEM default with double buffering); pad batch to a multiple.
    TB = min(512, _round_up(B, SUBLANE))
    B_pad = _round_up(B, TB)

    x_num_p = jnp.zeros((B_pad, n_num), jnp.float32).at[:B].set(
        x_num.astype(jnp.float32))
    x_cat_off = x_cat.astype(jnp.int32) + offsets
    x_cat_p = jnp.zeros((B_pad, n_emb), jnp.int32).at[:B].set(x_cat_off)

    kernel = _make_kernel(n_emb=n_emb, n_rest=n_rest)

    inputs = [x_num_p, x_cat_p, w1_num, folded, b1]
    for w, b in rest:
        inputs += [w, b]

    def batch_spec(width):
        return pl.BlockSpec((TB, width), lambda i: (i, 0))

    def resident_spec(arr):
        # Whole-array block pinned at (0,0): stays VMEM-resident across tiles.
        return pl.BlockSpec(arr.shape, lambda i: (0, 0))

    in_specs = [batch_spec(n_num), batch_spec(n_emb)]
    in_specs += [resident_spec(a) for a in inputs[2:]]

    out_pad = pl.pallas_call(
        kernel,
        out_shape=jax.ShapeDtypeStruct((B_pad, out_w), jnp.float32),
        grid=(B_pad // TB,),
        in_specs=in_specs,
        out_specs=batch_spec(out_w),
        compiler_params=pltpu.CompilerParams(
            dimension_semantics=("parallel",)),
    )(*inputs)

    return out_pad[:B, :num_target_classes]


# ---------------------------------------------------------------------------
# Parameter construction (deterministic, mimics the module's __init__ shapes)
# ---------------------------------------------------------------------------
def init_params(key, hidden_layers_sizes, cat_cardinalities, embedding_dims,
                num_numerical_features, num_target_classes):
    params = {"embeddings": [], "linears": []}
    n_emb = len(cat_cardinalities)

    keys = jax.random.split(key, n_emb + 1)
    # nn.Embedding default init: N(0, 1)
    for k, (card, dim) in zip(keys[:n_emb], zip(cat_cardinalities, embedding_dims)):
        params["embeddings"].append(jax.random.normal(k, (card, dim), jnp.float32))

    total_embedding_size = sum(embedding_dims)
    input_size = total_embedding_size + num_numerical_features
    layers_dims = [input_size] + list(hidden_layers_sizes) + [num_target_classes]

    lkeys = jax.random.split(keys[-1], 2 * (len(layers_dims) - 1))
    for i in range(len(layers_dims) - 1):
        fan_in, fan_out = layers_dims[i], layers_dims[i + 1]
        bound = 1.0 / (fan_in ** 0.5)  # nn.Linear default bound
        w = jax.random.uniform(lkeys[2 * i], (fan_in, fan_out), jnp.float32,
                               minval=-bound, maxval=bound)
        b = jax.random.uniform(lkeys[2 * i + 1], (fan_out,), jnp.float32,
                               minval=-bound, maxval=bound)
        params["linears"].append((w, b))
    return params


def build_fused_params(params, num_numerical_features, embedding_dims):
    """One-time parameter prep:
      * fold every embedding table into W1 (f32), stack into a single slab,
        pad rows to a multiple of 8, cast to bf16;
      * keep interior layer widths at their true size (bf16 weights,
        f32 biases);
      * pad only the last layer's output width to 128 lanes."""
    linears = params["linears"]
    n_layers = len(linears)
    w1, b1 = linears[0]
    h1 = w1.shape[1]
    # If the model has a single layer, its output IS the kernel output:
    # pad its width to a lane-dense 128 slab.
    h1_cols = _round_up(h1, LANE) if n_layers == 1 else h1

    # Numerical slice of W1.
    w1_num = jnp.zeros((num_numerical_features, h1_cols), jnp.float32)
    w1_num = w1_num.at[:, :h1].set(w1[:num_numerical_features, :])
    b1_row = jnp.zeros((1, h1_cols), jnp.float32).at[0, :h1].set(b1)

    # Fold each embedding table with its W1 row-slice (in f32), stack, pad.
    folded_rows = []
    offsets = []
    off_w = num_numerical_features
    row_off = 0
    for tbl, dim in zip(params["embeddings"], embedding_dims):
        folded_rows.append(tbl @ w1[off_w:off_w + dim, :])      # (card, h1) f32
        offsets.append(row_off)
        row_off += tbl.shape[0]
        off_w += dim
    total_rows = row_off
    total_rows_pad = _round_up(max(total_rows, SUBLANE), SUBLANE)
    folded = jnp.concatenate(folded_rows, axis=0)
    folded_pad = jnp.zeros((total_rows_pad, h1_cols), jnp.float32)
    folded_pad = folded_pad.at[:total_rows, :h1].set(folded)
    offsets = jnp.asarray(offsets, jnp.int32).reshape(1, -1)

    # Remaining layers: bf16 weights, f32 biases; last layer padded to 128.
    rest = []
    for li in range(1, n_layers):
        w, b = linears[li]
        din, dout = w.shape
        if li == n_layers - 1:
            dout_p = _round_up(dout, LANE)
            w_p = jnp.zeros((din, dout_p), jnp.float32).at[:, :dout].set(w)
            b_p = jnp.zeros((1, dout_p), jnp.float32).at[0, :dout].set(b)
        else:
            w_p = w
            b_p = b.reshape(1, dout)
        rest.append((w_p.astype(jnp.bfloat16), b_p.astype(jnp.float32)))

    return {
        "w1_num": w1_num.astype(jnp.bfloat16),
        "folded": folded_pad.astype(jnp.bfloat16),
        "b1": b1_row,
        "offsets": offsets,
        "rest": rest,
    }


# ---------------------------------------------------------------------------
# Pure-JAX reference (original, unpadded f32 params) for validation.
# ---------------------------------------------------------------------------
def forward_ref(params, x_num, x_cat):
    embedded = [tbl[x_cat[:, i]] for i, tbl in enumerate(params["embeddings"])]
    x = jnp.concatenate([x_num, jnp.concatenate(embedded, axis=1)], axis=1)
    n_layers = len(params["linears"])
    for i, (w, b) in enumerate(params["linears"]):
        x = x @ w + b
        if i < n_layers - 1:
            x = jnp.maximum(x, 0.0)
    return x


if __name__ == "__main__":
    # Small configuration consistent with the module's constructor.
    hidden_layers_sizes = [32, 32]
    cat_cardinalities = [10, 7, 5]
    embedding_dims = [4, 4, 8]
    num_numerical_features = 8
    num_target_classes = 4
    batch = 8

    key = jax.random.PRNGKey(0)
    pkey, nkey, ckey = jax.random.split(key, 3)

    params = init_params(pkey, hidden_layers_sizes, cat_cardinalities,
                         embedding_dims, num_numerical_features,
                         num_target_classes)
    fused_params = build_fused_params(params, num_numerical_features,
                                      embedding_dims)

    x_num = jax.random.normal(nkey, (batch, num_numerical_features), jnp.float32)
    x_cat = jnp.stack(
        [jax.random.randint(jax.random.fold_in(ckey, i), (batch,), 0, card)
         for i, card in enumerate(cat_cardinalities)],
        axis=1,
    ).astype(jnp.int32)

    out = forward(fused_params, x_num, x_cat,
                  num_target_classes=num_target_classes)
    out = jax.block_until_ready(out)

    ref = forward_ref(params, x_num, x_cat)
    assert out.shape == (batch, num_target_classes)
    # Weights are bf16 inside the kernel (f32 fold, then cast), so tolerance
    # is relaxed accordingly.
    assert jnp.allclose(out, ref, atol=5e-2, rtol=5e-2), "mismatch vs reference"

    print("KERNEL_OK")
</pallas_src>

<mosaic_0001>
module attributes {stable_mosaic.version = 11 : i64} {
  func.func @kernel(%arg0: i32, %arg1: memref<8x8xf32, #tpu.memory_space<vmem>>, %arg2: memref<8x3xi32, #tpu.memory_space<vmem>>, %arg3: memref<8x32xbf16, #tpu.memory_space<vmem>>, %arg4: memref<24x32xbf16, #tpu.memory_space<vmem>>, %arg5: memref<1x32xf32, #tpu.memory_space<vmem>>, %arg6: memref<32x32xbf16, #tpu.memory_space<vmem>>, %arg7: memref<1x32xf32, #tpu.memory_space<vmem>>, %arg8: memref<32x128xbf16, #tpu.memory_space<vmem>>, %arg9: memref<1x128xf32, #tpu.memory_space<vmem>>, %arg10: memref<8x128xf32, #tpu.memory_space<vmem>>) attributes {dimension_semantics = [#tpu.dimension_semantics<parallel>], iteration_bounds = array<i64: 1>, scalar_prefetch = 0 : i64, scratch_operands = 0 : i64, tpu.core_type = #tpu.core_type<tc>, window_params = [{transform_indices = @transform_0, window_bounds = array<i64: 8, 8>}, {transform_indices = @transform_1, window_bounds = array<i64: 8, 3>}, {pipeline_mode = #tpu.pipeline_mode<synchronous>, transform_indices = @transform_2, window_bounds = array<i64: 8, 32>}, {pipeline_mode = #tpu.pipeline_mode<synchronous>, transform_indices = @transform_3, window_bounds = array<i64: 24, 32>}, {pipeline_mode = #tpu.pipeline_mode<synchronous>, transform_indices = @transform_4, window_bounds = array<i64: 1, 32>}, {pipeline_mode = #tpu.pipeline_mode<synchronous>, transform_indices = @transform_5, window_bounds = array<i64: 32, 32>}, {pipeline_mode = #tpu.pipeline_mode<synchronous>, transform_indices = @transform_6, window_bounds = array<i64: 1, 32>}, {pipeline_mode = #tpu.pipeline_mode<synchronous>, transform_indices = @transform_7, window_bounds = array<i64: 32, 128>}, {pipeline_mode = #tpu.pipeline_mode<synchronous>, transform_indices = @transform_8, window_bounds = array<i64: 1, 128>}, {transform_indices = @transform_9, window_bounds = array<i64: 8, 128>}]} {
    %c0 = arith.constant 0 : index
    %c0_0 = arith.constant 0 : index
    %0 = vector.load %arg1[%c0, %c0_0] : memref<8x8xf32, #tpu.memory_space<vmem>>, vector<8x8xf32>
    %c0_1 = arith.constant 0 : index
    %c0_2 = arith.constant 0 : index
    %1 = vector.load %arg2[%c0_1, %c0_2] : memref<8x3xi32, #tpu.memory_space<vmem>>, vector<8x3xi32>
    %2 = arith.truncf %0 : vector<8x8xf32> to vector<8x8xbf16>
    %c0_3 = arith.constant 0 : index
    %c0_4 = arith.constant 0 : index
    %3 = vector.load %arg3[%c0_3, %c0_4] : memref<8x32xbf16, #tpu.memory_space<vmem>>, vector<8x32xbf16>
    %cst = arith.constant dense<0.000000e+00> : vector<8x32xf32>
    %4 = tpu.matmul %2, %3, %cst {dimension_numbers = #tpu.dot_dimension_numbers<[1], [0], [0], [1], [0, 0, 1, 1], [], []>} : vector<8x8xbf16>, vector<8x32xbf16>, vector<8x32xf32> -> vector<8x32xf32>
    %5 = tpu.iota {dimensions = array<i32: 1>} : vector<8x24xi32>
    %6 = vector.extract_strided_slice %1 {offsets = [0, 0], sizes = [8, 1], strides = [1, 1]} : vector<8x3xi32> to vector<8x1xi32>
    %7 = vector.broadcast %6 : vector<8x1xi32> to vector<8x24xi32>
    %8 = arith.cmpi eq, %7, %5 : vector<8x24xi32>
    %9 = vector.extract_strided_slice %1 {offsets = [0, 1], sizes = [8, 1], strides = [1, 1]} : vector<8x3xi32> to vector<8x1xi32>
    %10 = vector.broadcast %9 : vector<8x1xi32> to vector<8x24xi32>
    %11 = arith.cmpi eq, %10, %5 : vector<8x24xi32>
    %12 = arith.ori %8, %11 : vector<8x24xi1>
    %13 = vector.extract_strided_slice %1 {offsets = [0, 2], sizes = [8, 1], strides = [1, 1]} : vector<8x3xi32> to vector<8x1xi32>
    %14 = vector.broadcast %13 : vector<8x1xi32> to vector<8x24xi32>
    %15 = arith.cmpi eq, %14, %5 : vector<8x24xi32>
    %16 = arith.ori %12, %15 : vector<8x24xi1>
    %17 = arith.extui %16 : vector<8x24xi1> to vector<8x24xi32>
    %18 = arith.sitofp %17 : vector<8x24xi32> to vector<8x24xf32>
    %19 = arith.truncf %18 : vector<8x24xf32> to vector<8x24xbf16>
    %c0_5 = arith.constant 0 : index
    %c0_6 = arith.constant 0 : index
    %20 = vector.load %arg4[%c0_5, %c0_6] : memref<24x32xbf16, #tpu.memory_space<vmem>>, vector<24x32xbf16>
    %cst_7 = arith.constant dense<0.000000e+00> : vector<8x32xf32>
    %21 = tpu.matmul %19, %20, %cst_7 {dimension_numbers = #tpu.dot_dimension_numbers<[1], [0], [0], [1], [0, 0, 1, 1], [], []>} : vector<8x24xbf16>, vector<24x32xbf16>, vector<8x32xf32> -> vector<8x32xf32>
    %22 = arith.addf %4, %21 : vector<8x32xf32>
    %c0_8 = arith.constant 0 : index
    %c0_9 = arith.constant 0 : index
    %23 = vector.load %arg5[%c0_8, %c0_9] : memref<1x32xf32, #tpu.memory_space<vmem>>, vector<1x32xf32>
    %24 = vector.broadcast %23 : vector<1x32xf32> to vector<8x32xf32>
    %25 = arith.addf %22, %24 : vector<8x32xf32>
    %cst_10 = arith.constant 0.000000e+00 : f32
    %26 = vector.broadcast %cst_10 : f32 to vector<8x32xf32>
    %27 = arith.maximumf %25, %26 : vector<8x32xf32>
    %c0_11 = arith.constant 0 : index
    %c0_12 = arith.constant 0 : index
    %28 = vector.load %arg6[%c0_11, %c0_12] : memref<32x32xbf16, #tpu.memory_space<vmem>>, vector<32x32xbf16>
    %c0_13 = arith.constant 0 : index
    %c0_14 = arith.constant 0 : index
    %29 = vector.load %arg7[%c0_13, %c0_14] : memref<1x32xf32, #tpu.memory_space<vmem>>, vector<1x32xf32>
    %30 = arith.truncf %27 : vector<8x32xf32> to vector<8x32xbf16>
    %cst_15 = arith.constant dense<0.000000e+00> : vector<8x32xf32>
    %31 = tpu.matmul %30, %28, %cst_15 {dimension_numbers = #tpu.dot_dimension_numbers<[1], [0], [0], [1], [0, 0, 1, 1], [], []>} : vector<8x32xbf16>, vector<32x32xbf16>, vector<8x32xf32> -> vector<8x32xf32>
    %32 = vector.broadcast %29 : vector<1x32xf32> to vector<8x32xf32>
    %33 = arith.addf %31, %32 : vector<8x32xf32>
    %cst_16 = arith.constant 0.000000e+00 : f32
    %34 = vector.broadcast %cst_16 : f32 to vector<8x32xf32>
    %35 = arith.maximumf %33, %34 : vector<8x32xf32>
    %c0_17 = arith.constant 0 : index
    %c0_18 = arith.constant 0 : index
    %36 = vector.load %arg8[%c0_17, %c0_18] : memref<32x128xbf16, #tpu.memory_space<vmem>>, vector<32x128xbf16>
    %c0_19 = arith.constant 0 : index
    %c0_20 = arith.constant 0 : index
    %37 = vector.load %arg9[%c0_19, %c0_20] : memref<1x128xf32, #tpu.memory_space<vmem>>, vector<1x128xf32>
    %38 = arith.truncf %35 : vector<8x32xf32> to vector<8x32xbf16>
    %cst_21 = arith.constant dense<0.000000e+00> : vector<8x128xf32>
    %39 = tpu.matmul %38, %36, %cst_21 {dimension_numbers = #tpu.dot_dimension_numbers<[1], [0], [0], [1], [0, 0, 1, 1], [], []>} : vector<8x32xbf16>, vector<32x128xbf16>, vector<8x128xf32> -> vector<8x128xf32>
    %40 = vector.broadcast %37 : vector<1x128xf32> to vector<8x128xf32>
    %41 = arith.addf %39, %40 : vector<8x128xf32>
    %c0_22 = arith.constant 0 : index
    %c0_23 = arith.constant 0 : index
    %42 = vector.load %arg10[%c0_22, %c0_23] : memref<8x128xf32, #tpu.memory_space<vmem>>, vector<8x128xf32>
    tpu.vector_store %arg10[%c0_22, %c0_23], %41 {strides = array<i32>} : memref<8x128xf32, #tpu.memory_space<vmem>>, vector<8x128xf32>,
    return
  }
  func.func @transform_0(%arg0: i32) -> (i32, i32) {
    %c0_i32 = arith.constant 0 : i32
    %c0_i32_0 = arith.constant 0 : i32
    return %arg0, %c0_i32 : i32, i32
  }
  func.func @transform_1(%arg0: i32) -> (i32, i32) {
    %c0_i32 = arith.constant 0 : i32
    %c0_i32_0 = arith.constant 0 : i32
    return %arg0, %c0_i32 : i32, i32
  }
  func.func @transform_2(%arg0: i32) -> (i32, i32) {
    %c0_i32 = arith.constant 0 : i32
    %c0_i32_0 = arith.constant 0 : i32
    %c0_i32_1 = arith.constant 0 : i32
    return %c0_i32, %c0_i32_0 : i32, i32
  }
  func.func @transform_3(%arg0: i32) -> (i32, i32) {
    %c0_i32 = arith.constant 0 : i32
    %c0_i32_0 = arith.constant 0 : i32
    %c0_i32_1 = arith.constant 0 : i32
    return %c0_i32, %c0_i32_0 : i32, i32
  }
  func.func @transform_4(%arg0: i32) -> (i32, i32) {
    %c0_i32 = arith.constant 0 : i32
    %c0_i32_0 = arith.constant 0 : i32
    %c0_i32_1 = arith.constant 0 : i32
    return %c0_i32, %c0_i32_0 : i32, i32
  }
  func.func @transform_5(%arg0: i32) -> (i32, i32) {
    %c0_i32 = arith.constant 0 : i32
    %c0_i32_0 = arith.constant 0 : i32
    %c0_i32_1 = arith.constant 0 : i32
    return %c0_i32, %c0_i32_0 : i32, i32
  }
  func.func @transform_6(%arg0: i32) -> (i32, i32) {
    %c0_i32 = arith.constant 0 : i32
    %c0_i32_0 = arith.constant 0 : i32
    %c0_i32_1 = arith.constant 0 : i32
    return %c0_i32, %c0_i32_0 : i32, i32
  }
  func.func @transform_7(%arg0: i32) -> (i32, i32) {
    %c0_i32 = arith.constant 0 : i32
    %c0_i32_0 = arith.constant 0 : i32
    %c0_i32_1 = arith.constant 0 : i32
    return %c0_i32, %c0_i32_0 : i32, i32
  }
  func.func @transform_8(%arg0: i32) -> (i32, i32) {
    %c0_i32 = arith.constant 0 : i32
    %c0_i32_0 = arith.constant 0 : i32
    %c0_i32_1 = arith.constant 0 : i32
    return %c0_i32, %c0_i32_0 : i32, i32
  }
  func.func @transform_9(%arg0: i32) -> (i32, i32) {
    %c0_i32 = arith.constant 0 : i32
    %c0_i32_0 = arith.constant 0 : i32
    return %arg0, %c0_i32 : i32, i32
  }
}

</mosaic_0001>

<bundles_post_ra>
// kernel: forward.1
= control target key start
LH: loop header
LB: loop body
LE: loop exit
PB: predicated region body
PF: predicated region fallthrough
CT: control target
= control target key end

     0   :  { %14 = vsyncpa [#allocation3], 0  ;;  %s661_s0 = inlined_call_operand.vmem [shape: f32[8,8], index: 0, kind: input, shape index: {}]   ;;  %s662_s1 = inlined_call_operand.vmem [shape: s32[8,3], index: 1, kind: input, shape index: {}]   ;;  %s663_s2 = inlined_call_operand.hbm [shape: bf16[8,32], index: 2, kind: input, shape index: {}]   ;;  %s664_s3 = inlined_call_operand.hbm [shape: bf16[24,32], index: 3, kind: input, shape index: {}]   ;;  %s665_s4 = inlined_call_operand.hbm [shape: f32[1,32], index: 4, kind: input, shape index: {}]   ;;  %s666_s5 = inlined_call_operand.vmem [shape: bf16[32,32], index: 5, kind: input, shape index: {}]   ;;  %s667_s6 = inlined_call_operand.hbm [shape: f32[1,32], index: 6, kind: input, shape index: {}]   ;;  %s668_s7 = inlined_call_operand.vmem [shape: bf16[32,128], index: 7, kind: input, shape index: {}]   ;;  %s669_s8 = inlined_call_operand.hbm [shape: f32[1,128], index: 8, kind: input, shape index: {}]   ;;  %s670_s9 = inlined_call_operand.vmem [shape: f32[8,128], index: 9, kind: output, shape index: {}]  }
   0x1   :  { %15 = vsyncpa [#allocation5], 0 }
   0x2   :  { %16 = vsyncpa [#allocation8], 0  ;;  %s559_s30 = smov [#allocation4]  }
   0x3   :  { %s36_s10 = sshll.u32 %s559_s30, 4  ;;  %s37_s10 = int_to_ptr.vmem [resolvable:$true] %s36_s10 }
   0x4   :  { %s461_s11 = scalar_lea.vmem %s37_s10, 192  ;;  %p466_p1 = scmp.lt.s32.totalorder %s37_s10, %s37_s10 }
   0x5   :  { %p462_p0 = scmp.ne.s32.totalorder %s37_s10, %s461_s11  ;;  %p467_p2 = scmp.lt.s32.totalorder %s461_s11, %s461_s11 }
   0x7   :  { %p468_p3 = por %p467_p2, %p466_p1 }
   0x9   :  { %p469_p4 = pnand %p468_p3, %p462_p0 }
   0xb   :  { %472 = shalt.err (!%p469_p4)
}
   0xc   :  { %s560_s12 = smov 64   ;;  %s561_s13 = smov 4  }
   0xd   :  { %42 = dma.hbm_to_vmem [thread:$0]  %s664_s3, 192, %s37_s10, [#allocation5], %s560_s12, %s560_s12, %s561_s13  }
   0xe   :  { %s562_s16 = smov [#allocation7]   ;;  %s563_s18 = smov [#allocation2]  }
   0xf   :  { %s61_s17 = sshll.u32 %s562_s16, 4  ;;  %s27_s19 = sshll.u32 %s563_s18, 4  ;;  %s62_s17 = int_to_ptr.vmem [resolvable:$true] %s61_s17  ;;  %s28_s19 = int_to_ptr.vmem [resolvable:$true] %s27_s19 }
  0x10   :  { %s481_s20 = scalar_lea.vmem %s62_s17, 16  ;;  %s485_s21 = scalar_lea.vmem %s62_s17, 32 }
  0x11   :  { %p482_p5 = scmp.ne.s32.totalorder %s62_s17, %s481_s20  ;;  %p486_p6 = scmp.lt.s32.totalorder %s62_s17, %s62_s17 }
  0x12   :  { %p487_p7 = scmp.lt.s32.totalorder %s485_s21, %s481_s20 }
  0x14   :  { %p488_p8 = por %p487_p7, %p486_p6 }
  0x16   :  { %p489_p9 = pnand %p488_p8, %p482_p5 }
  0x18   :  { %492 = shalt.err (!%p489_p9)
}
  0x19   :  { %64 = dma.hbm_to_vmem [thread:$0]  %s667_s6, 16, %s62_s17, [#allocation8]  }
  0x1a   :  { %s501_s24 = scalar_lea.vmem %s28_s19, 64  ;;  %p506_p11 = scmp.lt.s32.totalorder %s28_s19, %s28_s19 }
  0x1b   :  { %p502_p10 = scmp.ne.s32.totalorder %s28_s19, %s501_s24  ;;  %p507_p12 = scmp.lt.s32.totalorder %s501_s24, %s501_s24 }
  0x1d   :  { %p508_p13 = por %p507_p12, %p506_p11 }
  0x1f   :  { %p509_p0 = pnand %p508_p13, %p502_p10 }
  0x21   :  { %512 = shalt.err (!%p509_p0)
}
  0x22   :  { %30 = dma.hbm_to_vmem [thread:$0]  %s663_s2, 64, %s28_s19, [#allocation3]  }
  0x23   :  { %s564_s26 = smov [#allocation6]   ;;  %s565_s28 = smov [#allocation9]  }
  0x24   :  { %s49_s27 = sshll.u32 %s564_s26, 4  ;;  %s73_s29 = sshll.u32 %s565_s28, 4  ;;  %s50_s27 = int_to_ptr.vmem [resolvable:$true] %s49_s27  ;;  %s74_s29 = int_to_ptr.vmem [resolvable:$true] %s73_s29 }
  0x25   :  { %s521_s30 = scalar_lea.vmem %s50_s27, 16  ;;  %s525_s6 = scalar_lea.vmem %s50_s27, 32 }
  0x26   :  { %p522_p1 = scmp.ne.s32.totalorder %s50_s27, %s521_s30  ;;  %p526_p2 = scmp.lt.s32.totalorder %s50_s27, %s50_s27 }
  0x27   :  { %p527_p3 = scmp.lt.s32.totalorder %s525_s6, %s521_s30 }
  0x29   :  { %p528_p4 = por %p527_p3, %p526_p2 }
  0x2b   :  { %p529_p5 = pnand %p528_p4, %p522_p1 }
  0x2d   :  { %532 = shalt.err (!%p529_p5)
}
  0x2e   :  { %52 = dma.hbm_to_vmem [thread:$0]  %s665_s4, 16, %s50_s27, [#allocation5]  }
  0x2f   :  { %s541_s12 = scalar_lea.vmem %s74_s29, 16  ;;  %s545_s2 = scalar_lea.vmem %s74_s29, 32 }
  0x30   :  { %p542_p6 = scmp.ne.s32.totalorder %s74_s29, %s541_s12  ;;  %p546_p7 = scmp.lt.s32.totalorder %s74_s29, %s74_s29 }
  0x31   :  { %p547_p8 = scmp.lt.s32.totalorder %s545_s2, %s541_s12 }
  0x33   :  { %p548_p9 = por %p547_p8, %p546_p7 }
  0x35   :  { %p549_p10 = pnand %p548_p9, %p542_p6 }
  0x37   :  { %552 = shalt.err (!%p549_p10)
}
  0x38   :  { %76 = dma.hbm_to_vmem [thread:$0]  %s669_s8, 16, %s74_s29, [#allocation8]  }
  0x39   :  { %553 = dma.done.wait [#allocation3], 64  }
  0x3a   :  { %554 = vsyncadd [#allocation3], 4294967232 }
  0x3b   :  { %555 = dma.done.wait [#allocation5], 208  }
  0x3c   :  { %556 = vsyncadd [#allocation5], 4294967088 }
  0x3d   :  { %557 = dma.done.wait [#allocation8], 32  }
  0x3e   :  { %558 = vsyncadd [#allocation8], 4294967264  ;;  %v566_v0 = vmov 0   ;;  %v567_v1 = vmov 2   ;;  %v568_v2 = vmov 0.0   ;;  %vm132_vm0 = vcmask 1043456  }
  0x3f   :  { %443 = vset.pattern.permute.xlu0 %v566_v0  ;;  %445 = vset.pattern.permute.xlu1 %v567_v1  ;;  %vm569_vm1 = vmmov 0   ;;  %v94_v3 = vld [vmem:[%s662_s1] sm:$0xff]  ;;  %v447_v6 = vld [vmem:[#allocation4 + $0x8] ss:$0 sps:$4 sm:$0xff]   ;;  %vm176_vm2 = vcmask 64512   ;;  %v570_v11 = vmov 1   ;;  %v97_v12 = vlaneseq }
  0x40   :  { %409 = vmatprep.subr.bf16.mxu1 %v568_v2  ;;  %401 = vmatprep.subr.bf16.mxu0 %v568_v2  ;;  %v96_v4 = vld [vmem:[#allocation2] sm:$0xf]  ;;  %v134_v9 = vsel %vm132_vm0, %v447_v6, 0  ;;  %v448_v10 = vld [vmem:[#allocation4] sm:$0xff]   ;;  %vm128_vm8 = vcmask 195584   ;;  %vm256_vm9 = vcmask 261120  }
  0x41   :  { %411 = vmatprep.mubr.msk.bf16.mxu1 %vm569_vm1, %v568_v2  ;;  %405 = vmatprep.mubr.msk.bf16.mxu0 %vm569_vm1, %v568_v2  ;;  %v181_v5 = vsel %vm132_vm0, %v96_v4, 0  ;;  %v93_v7 = vld [vmem:[%s661_s0] sm:$0xff]  ;;  %v98_v14 = vand.u32 127, %v97_v12  ;;  %v449_v21 = vld [vmem:[%s666_s5 + $0x8] sm:$0xff]   ;;  %v381_v27 = vld [vmem:[#allocation6] ss:$0 sm:$0xff] }
  0x42   :  { %100 = vperm.xlu0 %443, %v94_v3   ;;  %109 = vperm.xlu1 %445, %v94_v3   ;;  %v95_v8 = vpack.c.bf16 %v93_v7, %v93_v7  ;;  %v450_v24 = vld [vmem:[%s666_s5] sm:$0xff]   ;;  %v451_v25 = vld [vmem:[%s668_s7 + $0x8] sm:$0xff]   ;;  %v382_v36 = vld [vmem:[#allocation7] ss:$0 sm:$0xff] }
  0x43   :  { %410 = vmatpush3.bf16.msra.mxu1 %v181_v5  ;;  %402 = vmatpush3.bf16.msra.mxu0 %v134_v9  ;;  %v452_v35 = vld [vmem:[%s668_s7] sm:$0xff]   ;;  %v386_v44 = vld [vmem:[#allocation9] ss:$0 sm:$0xff] }
  0x44   :  { %415 = vmatprep.subr.bf16.mxu1 %v568_v2  ;;  %403 = vmatprep.subr.bf16.mxu0 %v568_v2 }
  0x46   :  { %444 = vset.pattern.permute.xlu0 %v570_v11  ;;  %412 = vmatmul.mubr.msk.bf16.vlgmr.msra.gmra.mxu1 %vm176_vm2, %v95_v8 }
  0x47   :  { %104 = vperm.xlu0 %444, %v94_v3   ;;  %419 = vmatprep.mubr.msk.bf16.mxu1 %vm569_vm1, %v568_v2 }
  0x48   :  { %404 = vmatpush3.bf16.msra.mxu0 %v448_v10  ;;  %416 = vmatpush3.bf16.msra.mxu1 %v449_v21 }
  0x49   :  { %423 = vmatprep.subr.bf16.mxu0 %v568_v2  ;;  %417 = vmatprep.subr.bf16.mxu1 %v568_v2 }
  0x4b   :  { %446 = vset.pattern.permute.xlu0 %v567_v1 }
  0x4c   :  { %418 = vmatpush3.bf16.msra.mxu1 %v450_v24 }
  0xbd   :  { %v101_v13 = vpop.permute.xlu0 %100  ;;  %v110_v15 = vpop.permute.xlu1 %109 }
  0xbe   :  { %vm111_vm3 = vcmp.eq.s32.totalorder %v110_v15, %v98_v14  ;;  %vm102_vm4 = vcmp.eq.s32.totalorder %v101_v13, %v98_v14 }
  0xc2   :  { %v105_v16 = vpop.permute.xlu0 %104 }
  0xc3   :  { %vm106_vm5 = vcmp.eq.s32.totalorder %v105_v16, %v98_v14 }
  0xc4   :  { %vm107_vm6 = vmor %vm102_vm4, %vm106_vm5 }
  0xc5   :  { %vm112_vm7 = vmor %vm107_vm6, %vm111_vm3 }
  0xc6   :  { %v376_v17 = vsel %vm112_vm7, 1.0, %v568_v2 }
  0xc7   :  { %v115_v18 = vpack.c.bf16 %v376_v17, %v376_v17 }
  0xc9   :  { %406 = vmatmul.mubr.msk.bf16.vlgmr.msra.gmra.mxu0 %vm128_vm8, %v115_v18 }
  0xca   :  { %427 = vmatprep.mubr.msk.bf16.mxu0 %vm569_vm1, %v568_v2  ;;  %424 = vmatpush3.bf16.msra.mxu0 %v451_v25 }
  0xcb   :  { %425 = vmatprep.subr.bf16.mxu0 %v568_v2 }
  0xce   :  { %426 = vmatpush3.bf16.msra.mxu0 %v452_v35 }
 0x106   :  { %v217_v19 = vpop.f32.mrf.mxu1 }
 0x108   :  { %v413_v20 = vpop.f32.mrf.mxu1 }
 0x10a   :  { %v220_v22 = vpop.f32.mrf.mxu1 }
 0x10c   :  { %v414_v23 = vpop.f32.mrf.mxu1 }
 0x189   :  { %v170_v26 = vpop.f32.mrf.mxu0 }
 0x18a   :  { %v218_v28 = vadd.f32 %v217_v19, %v170_v26 }
 0x18b   :  { %v407_v29 = vpop.f32.mrf.mxu0 }
 0x18c   :  { %v230_v30 = vadd.f32 %v381_v27, %v218_v28 }
 0x18d   :  { %v173_v31 = vpop.f32.mrf.mxu0 }
 0x18e   :  { %v231_v32 = vmax.f32 %v230_v30, 0.0 }
 0x18f   :  { %v408_v33 = vpop.f32.mrf.mxu0 }
 0x190   :  { %v237_v34 = vpack.c.bf16 %v231_v32, %v231_v32 }
 0x192   :  { %420 = vmatmul.mubr.msk.bf16.vlgmr.msra.gmra.mxu1 %vm256_vm9, %v237_v34 }
 0x252   :  { %v294_v37 = vpop.f32.mrf.mxu1 }
 0x253   :  { %v295_v38 = vadd.f32 %v382_v36, %v294_v37 }
 0x254   :  { %v421_v39 = vpop.f32.mrf.mxu1 }
 0x255   :  { %v300_v40 = vmax.f32 %v295_v38, 0.0 }
 0x256   :  { %v297_v41 = vpop.f32.mrf.mxu1 }
 0x257   :  { %v306_v42 = vpack.c.bf16 %v300_v40, %v300_v40 }
 0x258   :  { %v422_v43 = vpop.f32.mrf.mxu1 }
 0x259   :  { %428 = vmatmul.mubr.msk.bf16.vlgmr.msra.gmra.mxu0 %vm256_vm9, %v306_v42 }
 0x319   :  { %v362_v45 = vpop.f32.mrf.mxu0 }
 0x31a   :  { %v363_v46 = vadd.f32 %v386_v44, %v362_v45 }
 0x31b   :  { %v429_v47 = vpop.f32.mrf.mxu0 }
 0x31c   :  { %368 = vst [vmem:[%s670_s9] sm:$0xff] %v363_v46 }
 0x31d   :  { %v365_v48 = vpop.f32.mrf.mxu0 }
 0x31f   :  { %v430_v49 = vpop.f32.mrf.mxu0 }
 0x320   :  { %373 = vsyncpa [#allocation3], 1 }
 0x321   :  { %374 = vsyncpa [#allocation5], 1 }
 0x322   :  { %375 = vsyncpa [#allocation8], 1 }

</bundles_post_ra>
